<compile_context>
chip_gen: v5e
topology: v5e:2x2
jax: 0.10.0
libtpu: 0.0.40
codegen_flags: <defaults>
</compile_context>

<pallas_src>
import jax
import jax.numpy as jnp
from jax.experimental import pallas as pl
from jax.experimental.pallas import tpu as pltpu

_LANE = 128  # vreg lane width; lane-dense last dim avoids masked partial stores


def _copy_kernel(x_ref, o_ref):
    # Hot path: pure pass-through of the current VMEM tile.
    o_ref[...] = x_ref[...]


def _pick_tile_rows(rows, cap=1024):
    """Largest tile (<= cap rows) that evenly divides `rows`.

    cap=1024 rows x 128 lanes x 4 B = 512 KiB per tile -> fits double-buffered
    (in + out) well under the 16/32/32 MiB scoped VMEM defaults of v5e/v6e/v7x
    while being large enough (>=512 rows when possible) to reach ~85% of the
    HBM roofline on copy-style kernels.
    """
    if rows <= cap:
        return rows
    for cand in (1024, 512, 256, 128, 64, 32, 16, 8):
        if cand <= cap and rows % cand == 0:
            return cand
    return rows  # full-extent fallback (always a legal block shape)


def print_size(arr, label=""):
    """JAX/Pallas equivalent of PrintSize.forward: print shape, return arr."""
    # Host-side / trace-time print, same semantics as `print(label, arr.size())`.
    print(label, tuple(arr.shape))

    orig_shape = arr.shape
    total = arr.size

    # Lane-dense layout: make the last dim a full 128-lane multiple when
    # possible; otherwise fall back to keeping the original last dim (full
    # extent blocks are always legal even if < 128).
    if total % _LANE == 0:
        lanes = _LANE
    else:
        lanes = orig_shape[-1]
    rows = total // lanes
    x2d = arr.reshape(rows, lanes)

    tile_rows = _pick_tile_rows(rows)
    grid = (rows // tile_rows,)

    out2d = pl.pallas_call(
        _copy_kernel,
        out_shape=jax.ShapeDtypeStruct((rows, lanes), arr.dtype),
        grid=grid,
        in_specs=[pl.BlockSpec((tile_rows, lanes), lambda i: (i, 0))],
        out_specs=pl.BlockSpec((tile_rows, lanes), lambda i: (i, 0)),
        # Identity op: alias input buffer to output buffer so no second HBM
        # allocation / writeback is required when the input is donatable.
        input_output_aliases={0: 0},
        compiler_params=pltpu.CompilerParams(
            # Row-tile axis is embarrassingly parallel -> shard across the
            # 2 TensorCores on v7x when grid > 1.
            dimension_semantics=("parallel",),
        ),
    )(x2d)

    return out2d.reshape(orig_shape)


if __name__ == "__main__":
    key = jax.random.PRNGKey(0)
    # Small NCHW input consistent with a conv-net feature map.
    x = jax.random.normal(key, (2, 4, 16, 16), dtype=jnp.float32)

    y = print_size(x, label="print-size")
    y = jax.block_until_ready(y)

    assert y.shape == x.shape and y.dtype == x.dtype
    assert bool(jnp.all(y == x))
    print("KERNEL_OK")
</pallas_src>

<mosaic_0001>
module attributes {stable_mosaic.version = 11 : i64} {
  func.func @_copy_kernel(%arg0: i32, %arg1: memref<16x128xf32, #tpu.memory_space<vmem>>, %arg2: memref<16x128xf32, #tpu.memory_space<vmem>>) attributes {dimension_semantics = [#tpu.dimension_semantics<parallel>], iteration_bounds = array<i64: 1>, scalar_prefetch = 0 : i64, scratch_operands = 0 : i64, tpu.core_type = #tpu.core_type<tc>, window_params = [{transform_indices = @transform_0, window_bounds = array<i64: 16, 128>}, {transform_indices = @transform_1, window_bounds = array<i64: 16, 128>}]} {
    %c0 = arith.constant 0 : index
    %c0_0 = arith.constant 0 : index
    %0 = vector.load %arg1[%c0, %c0_0] : memref<16x128xf32, #tpu.memory_space<vmem>>, vector<16x128xf32>
    %c0_1 = arith.constant 0 : index
    %c0_2 = arith.constant 0 : index
    %1 = vector.load %arg2[%c0_1, %c0_2] : memref<16x128xf32, #tpu.memory_space<vmem>>, vector<16x128xf32>
    tpu.vector_store %arg2[%c0_1, %c0_2], %0 {strides = array<i32>} : memref<16x128xf32, #tpu.memory_space<vmem>>, vector<16x128xf32>,
    return
  }
  func.func @transform_0(%arg0: i32) -> (i32, i32) {
    %c0_i32 = arith.constant 0 : i32
    %c0_i32_0 = arith.constant 0 : i32
    return %arg0, %c0_i32 : i32, i32
  }
  func.func @transform_1(%arg0: i32) -> (i32, i32) {
    %c0_i32 = arith.constant 0 : i32
    %c0_i32_0 = arith.constant 0 : i32
    return %arg0, %c0_i32 : i32, i32
  }
}

</mosaic_0001>

<bundles_post_ra>
// kernel: tpu_custom_call.1
= control target key start
LH: loop header
LB: loop body
LE: loop exit
PB: predicated region body
PF: predicated region fallthrough
CT: control target
= control target key end

     0   :  { %6 = vsyncpa [#allocation3], 0  ;;  %s124_s0 = inlined_call_operand.hbm [shape: f32[16,128], index: 0, kind: input, shape index: {}, may-alias: {0,1}]   ;;  %s125_s1 = inlined_call_operand.hbm [shape: f32[16,128], index: 1, kind: output, shape index: {}, may-alias: {0,1}]  }
   0x1   :  { %7 = vsyncpa [#allocation4], 0  ;;  %s12_s8 = sshll.u32 %s124_s0, 4  ;;  %s104_s9 = smov [#allocation2]   ;;  %s13_s8 = int_to_ptr.hbm [resolvable:$true] %s12_s8 }
   0x2   :  { %s14_s10 = sshll.u32 %s104_s9, 4  ;;  %s105_s11 = smov 128   ;;  %s15_s10 = int_to_ptr.vmem [resolvable:$true] %s14_s10 }
   0x3   :  { %s106_s12 = smov 8  }
   0x4   :  { %20 = dma.hbm_to_vmem [thread:$0]  %s13_s8, 256, %s15_s10, [#allocation3], %s105_s11, %s105_s11, %s106_s12  }
   0x5   :  { %100 = dma.done.wait [#allocation3], 256  }
   0x6   :  { %101 = vsyncadd [#allocation3], 4294967040  ;;  %s107_s13 = smov [#allocation5]   ;;  %s35_s17 = sshll.u32 %s125_s1, 4  ;;  %v25_v0 = vld [vmem:[#allocation2] sm:$0xff]  ;;  %v26_v1 = vld [vmem:[#allocation2 + $0x8] sm:$0xff]  ;;  %s36_s17 = int_to_ptr.hbm [resolvable:$true] %s35_s17 }
   0x7   :  { %s33_s14 = sshll.u32 %s107_s13, 4  ;;  %27 = vst [vmem:[#allocation5] sm:$0xff] %v25_v0  ;;  %s34_s14 = int_to_ptr.vmem [resolvable:$true] %s33_s14 }
   0x8   :  { %28 = vst [vmem:[#allocation5 + $0x8] sm:$0xff] %v26_v1 }
   0x9   :  { %41 = dma.vmem_to_hbm [thread:$0]  %s34_s14, 256, %s36_s17, [#allocation4], %s105_s11, %s105_s11, %s106_s12  }
   0xa   :  { %102 = dma.done.wait [#allocation4], 256  }
   0xb   :  { %103 = vsyncadd [#allocation4], 4294967040 }
   0xc   :  { %46 = vsyncpa [#allocation3], 1 }
   0xd   :  { %47 = vsyncpa [#allocation4], 1 }

</bundles_post_ra>
